<compile_context>
chip_gen: v7x
topology: tpu7x:2x2x1
jax: 0.10.0
libtpu: 0.0.40
codegen_flags: <defaults>
</compile_context>

<pallas_src>
import jax
import jax.numpy as jnp
from jax.experimental import pallas as pl
from jax.experimental.pallas import tpu as pltpu

_ADC_MAX_CODE = 127.0                  # 7-bit ADC -> codes 0 .. 127
_Q_SCALE = _ADC_MAX_CODE / 25.0        # (9.92e-6/25) * (127/9.92e-6) == 127/25
_DQ_SCALE = 25.0 / _ADC_MAX_CODE       # code * 25 / 127

_LANE = 128
_BLOCK_BYTES = 4 * 1024 * 1024         # ~4 MiB per block buffer
_MIN_BLOCK_BYTES = 512 * 1024          # never shrink blocks below this
_TARGET_GRID = 4                       # >=2 so both v7x TensorCores get work
_VMEM_LIMIT = 32 * 1024 * 1024         # 4 bufs x 4 MiB = 16 MiB + headroom
_RAGGED_SINGLE_BLOCK_BYTES = 8 * 1024 * 1024


def _relu_adc_kernel(x_ref, o_ref):
    # Ideal linear ADC characteristic (stand-in for ADC_Char(., InterpolF)):
    # quantize to an integer code, clamp to [0, 127], dequantize to [0, 25].
    x = x_ref[...].astype(jnp.float32)
    code = jnp.clip(jnp.round(x * _Q_SCALE), 0.0, _ADC_MAX_CODE)
    o_ref[...] = (code * _DQ_SCALE).astype(o_ref.dtype)


def _round_up(x, m):
    return ((x + m - 1) // m) * m


def _sublane_multiple(itemsize):
    # Min second-to-last tile dim: f32 -> 8, bf16/f16 -> 16, int8/fp8 -> 32.
    return 8 * max(1, 4 // itemsize)


def _compiler_params():
    return pltpu.CompilerParams(
        dimension_semantics=("parallel",),
        vmem_limit_bytes=_VMEM_LIMIT,
    )


def _choose_block_rows(rows, width, itemsize):
    """Rows per block sized by bytes, split toward >=_TARGET_GRID grid steps."""
    sub = _sublane_multiple(itemsize)
    if rows <= sub:
        return rows                                    # full-extent block
    row_bytes = width * itemsize
    by_budget = max(sub, (_BLOCK_BYTES // row_bytes) // sub * sub)
    by_split = _round_up(pl.cdiv(rows, _TARGET_GRID), sub)
    floor_rows = max(sub, (_MIN_BLOCK_BYTES // row_bytes) // sub * sub)
    br = min(by_budget, max(by_split, floor_rows))
    if br >= rows:
        return rows                                    # single full block
    return br


def _run_2d(x2d):
    """Elementwise kernel over a lane-dense 2-D slab (rows, width % 128 == 0)."""
    rows, width = x2d.shape
    br = _choose_block_rows(rows, width, x2d.dtype.itemsize)
    grid = (pl.cdiv(rows, br),)
    return pl.pallas_call(
        _relu_adc_kernel,
        out_shape=jax.ShapeDtypeStruct((rows, width), x2d.dtype),
        grid_spec=pltpu.PrefetchScalarGridSpec(
            num_scalar_prefetch=0,
            grid=grid,
            in_specs=[pl.BlockSpec((br, width), lambda i: (i, 0))],
            out_specs=pl.BlockSpec((br, width), lambda i: (i, 0)),
        ),
        compiler_params=_compiler_params(),
    )(x2d)


def _run_1d(flat):
    """Ragged sizes (n % 128 != 0): run on the flat array directly, no pad/slice."""
    n = flat.shape[0]
    itemsize = flat.dtype.itemsize
    tile = _sublane_multiple(itemsize) * _LANE
    if n * itemsize <= _RAGGED_SINGLE_BLOCK_BYTES:
        block = n                                  # full-extent block, grid=(1,)
    else:
        by_budget = max(tile, (_BLOCK_BYTES // itemsize) // tile * tile)
        by_split = _round_up(pl.cdiv(n, _TARGET_GRID), tile)
        floor_elems = max(tile, (_MIN_BLOCK_BYTES // itemsize) // tile * tile)
        block = min(by_budget, max(by_split, floor_elems))
        if block >= n:
            block = n
    grid = (pl.cdiv(n, block),)
    return pl.pallas_call(
        _relu_adc_kernel,
        out_shape=jax.ShapeDtypeStruct((n,), flat.dtype),
        grid_spec=pltpu.PrefetchScalarGridSpec(
            num_scalar_prefetch=0,
            grid=grid,
            in_specs=[pl.BlockSpec((block,), lambda i: (i,))],
            out_specs=pl.BlockSpec((block,), lambda i: (i,)),
        ),
        compiler_params=_compiler_params(),
    )(flat)


def relu_adc(x):
    """Pallas implementation of ReLU_adc.forward; preserves the input dtype."""
    orig_shape = x.shape
    flat = x.reshape(-1)                 # metadata-only for contiguous inputs
    n = flat.shape[0]
    # Widest lane-dense last dim (multiple of 128) that divides n exactly ->
    # no padding copy needed for typical activation sizes.
    for width in (2048, 1024, 512, 256, _LANE):
        if n % width == 0:
            return _run_2d(flat.reshape(-1, width)).reshape(orig_shape)
    return _run_1d(flat).reshape(orig_shape)


def _reference(x):
    # Pure-JAX reference of the same (ideal-ADC, folded-constant) semantics.
    code = jnp.clip(jnp.round(x.astype(jnp.float32) * _Q_SCALE),
                    0.0, _ADC_MAX_CODE)
    return (code * _DQ_SCALE).astype(x.dtype)


if __name__ == "__main__":
    key = jax.random.PRNGKey(0)
    # NCHW activations; scale so values span the ADC's useful range [0, 25].
    x = jax.random.normal(key, (2, 4, 16, 16), dtype=jnp.float32) * 10.0

    y = relu_adc(x)
    y = jax.block_until_ready(y)

    y_ref = _reference(x)
    assert y.shape == x.shape and y.dtype == x.dtype
    assert jnp.allclose(y, y_ref, atol=1e-6), "mismatch vs reference"

    print("KERNEL_OK")
</pallas_src>

<mosaic_0001>
module attributes {stable_mosaic.version = 11 : i64} {
  func.func @_relu_adc_kernel(%arg0: i32, %arg1: memref<1x2048xf32, #tpu.memory_space<vmem>>, %arg2: memref<1x2048xf32, #tpu.memory_space<vmem>>) attributes {dimension_semantics = [#tpu.dimension_semantics<parallel>], iteration_bounds = array<i64: 1>, scalar_prefetch = 0 : i64, scratch_operands = 0 : i64, tpu.core_type = #tpu.core_type<tc>, window_params = [{transform_indices = @transform_0, window_bounds = array<i64: 1, 2048>}, {transform_indices = @transform_1, window_bounds = array<i64: 1, 2048>}]} {
    %c0 = arith.constant 0 : index
    %c0_0 = arith.constant 0 : index
    %0 = vector.load %arg1[%c0, %c0_0] : memref<1x2048xf32, #tpu.memory_space<vmem>>, vector<1x2048xf32>
    %cst = arith.constant 5.080000e+00 : f32
    %1 = vector.broadcast %cst : f32 to vector<1x2048xf32>
    %2 = arith.mulf %0, %1 : vector<1x2048xf32>
    %3 = math.roundeven %2 : vector<1x2048xf32>
    %cst_1 = arith.constant 0.000000e+00 : f32
    %cst_2 = arith.constant 1.270000e+02 : f32
    %4 = vector.broadcast %cst_1 : f32 to vector<1x2048xf32>
    %5 = arith.maximumf %4, %3 : vector<1x2048xf32>
    %6 = vector.broadcast %cst_2 : f32 to vector<1x2048xf32>
    %7 = arith.minimumf %6, %5 : vector<1x2048xf32>
    %cst_3 = arith.constant 0.196850389 : f32
    %8 = vector.broadcast %cst_3 : f32 to vector<1x2048xf32>
    %9 = arith.mulf %7, %8 : vector<1x2048xf32>
    %c0_4 = arith.constant 0 : index
    %c0_5 = arith.constant 0 : index
    %10 = vector.load %arg2[%c0_4, %c0_5] : memref<1x2048xf32, #tpu.memory_space<vmem>>, vector<1x2048xf32>
    tpu.vector_store %arg2[%c0_4, %c0_5], %9 {strides = array<i32>} : memref<1x2048xf32, #tpu.memory_space<vmem>>, vector<1x2048xf32>,
    return
  }
  func.func @transform_0(%arg0: i32) -> (i32, i32) {
    %c0_i32 = arith.constant 0 : i32
    %c0_i32_0 = arith.constant 0 : i32
    return %arg0, %c0_i32 : i32, i32
  }
  func.func @transform_1(%arg0: i32) -> (i32, i32) {
    %c0_i32 = arith.constant 0 : i32
    %c0_i32_0 = arith.constant 0 : i32
    return %arg0, %c0_i32 : i32, i32
  }
}

</mosaic_0001>

<bundles_post_ra>
// kernel: tpu_custom_call.1
= control target key start
LH: loop header
LB: loop body
LE: loop exit
PB: predicated region body
PF: predicated region fallthrough
CT: control target
= control target key end

     0   :  { %6 = vsyncpa [#allocation3], 0  ;;  %s138_s0 = inlined_call_operand.hbm [shape: f32[1,2048], index: 0, kind: input, shape index: {}]   ;;  %s139_s1 = inlined_call_operand.hbm [shape: f32[1,2048], index: 1, kind: output, shape index: {}]  }
   0x1   :  { %7 = vsyncpa [#allocation4], 0  ;;  %s102_s6 = smov [#allocation2]   ;;  %s54_s10 = scalar_lea.hbm %s138_s0, 256 }
   0x2   :  { %s14_s7 = sshll.u32 %s102_s6, 4  ;;  %p55_p0 = scmp.ne.s32.totalorder %s138_s0, %s54_s10  ;;  %s15_s7 = int_to_ptr.vmem [resolvable:$true] %s14_s7 }
   0x3   :  { %p58_p1 = scmp.lt.u32.totalorder %s54_s10, %s138_s0 }
   0x5   :  { %p60_p2 = pnand %p58_p1, %p55_p0 }
   0x7   :  { %63 = shalt.err (!%p60_p2)
}
   0x8   :  { %s64_s15 = scalar_lea.vmem %s15_s7, 256  ;;  %p69_p4 = scmp.lt.s32.totalorder %s15_s7, %s15_s7 }
   0x9   :  { %p65_p3 = scmp.ne.s32.totalorder %s15_s7, %s64_s15  ;;  %p70_p5 = scmp.lt.s32.totalorder %s64_s15, %s64_s15 }
   0xb   :  { %p71_p6 = por %p70_p5, %p69_p4 }
   0xd   :  { %p72_p7 = pnand %p71_p6, %p65_p3 }
   0xf   :  { %75 = shalt.err (!%p72_p7)
}
  0x10   :  { %17 = dma.hbm_to_vmem [thread:$0]  %s138_s0, 256, %s15_s7, [#allocation3]  }
  0x11   :  { %98 = dma.done.wait [#allocation3], 256  }
  0x12   :  { %99 = vsyncadd [#allocation3], 4294967040  ;;  %v21_v0 = vld [vmem:[#allocation2] sm:$0xff]  ;;  %v22_v1 = vld [vmem:[#allocation2 + $0x8] sm:$0xff]  ;;  %s103_s18 = smov [#allocation5]  }
  0x13   :  { %v23_v2 = vmul.f32 5.08, %v21_v0  ;;  %v24_v3 = vmul.f32 5.08, %v22_v1  ;;  %s41_s19 = sshll.u32 %s103_s18, 4  ;;  %s42_s19 = int_to_ptr.vmem [resolvable:$true] %s41_s19 }
  0x14   :  { %s76_s0 = scalar_lea.vmem %s42_s19, 256  ;;  %p81_p9 = scmp.lt.s32.totalorder %s42_s19, %s42_s19 }
  0x15   :  { %v50_v4 = vround.rtne.f32 %v23_v2  ;;  %v51_v5 = vround.rtne.f32 %v24_v3  ;;  %p77_p8 = scmp.ne.s32.totalorder %s42_s19, %s76_s0  ;;  %p82_p10 = scmp.lt.s32.totalorder %s76_s0, %s76_s0 }
  0x17   :  { %v27_v6 = vmax.f32 %v50_v4, 0.0  ;;  %v28_v7 = vmax.f32 %v51_v5, 0.0  ;;  %p83_p11 = por %p82_p10, %p81_p9 }
  0x19   :  { %v29_v8 = vmin.f32 %v27_v6, 127.0  ;;  %v30_v9 = vmin.f32 %v28_v7, 127.0  ;;  %p84_p12 = pnand %p83_p11, %p77_p8 }
  0x1b   :  { %v31_v10 = vmul.f32 0.19685039, %v29_v8  ;;  %v32_v11 = vmul.f32 0.19685039, %v30_v9 }
  0x1d   :  { %33 = vst [vmem:[#allocation5] sm:$0xff] %v31_v10  ;;  %34 = vst [vmem:[#allocation5 + $0x8] sm:$0xff] %v32_v11 }
  0x1e   :  { %87 = shalt.err (!%p84_p12)
}
  0x1f   :  { %s88_s22 = scalar_lea.hbm %s139_s1, 256 }
  0x20   :  { %p89_p13 = scmp.ne.s32.totalorder %s139_s1, %s88_s22  ;;  %p92_p0 = scmp.lt.u32.totalorder %s88_s22, %s139_s1 }
  0x22   :  { %p94_p1 = pnand %p92_p0, %p89_p13 }
  0x24   :  { %97 = shalt.err (!%p94_p1)
}
  0x25   :  { %44 = dma.vmem_to_hbm [thread:$0]  %s42_s19, 256, %s139_s1, [#allocation4]  }
  0x26   :  { %100 = dma.done.wait [#allocation4], 256  }
  0x27   :  { %101 = vsyncadd [#allocation4], 4294967040 }
  0x28   :  { %48 = vsyncpa [#allocation3], 1 }
  0x29   :  { %49 = vsyncpa [#allocation4], 1 }

</bundles_post_ra>
